<compile_context>
chip_gen: v6e
topology: v6e:2x2x1
jax: 0.10.0
libtpu: 0.0.40
codegen_flags: <defaults>
</compile_context>

<pallas_src>
import functools

import jax
import jax.numpy as jnp
import numpy as np
from jax.experimental import pallas as pl
from jax.experimental.pallas import tpu as pltpu

EPS = 1e-5

_VMEM = pl.BlockSpec(memory_space=pltpu.MemorySpace.VMEM)


def basic_block_kernel(x_ref, wb1_ref, wb2_ref, gb_ref, pool_ref, o_ref, *,
                       height):
    """Fused conv1+bn1+relu+conv2+bn2+add+relu on a lane-dense (N*H, W*C) tile.

    x_ref:    (N*H, W*C) f32 activations (lane dim = W*C).
    wb*_ref:  (3*W*C, W*C) bf16 K-concatenated banded conv weights.
    gb_ref:   (4, W*C) f32 = [gamma1; beta1; gamma2; beta2] tiled across W.
    pool_ref: (W*C, W*C) f32 channel-pooling matrix (1/(N*H*W) on matching
              channel lanes) used to fold + re-broadcast BN statistics.
    """
    n_rows, wc = x_ref.shape

    x32 = x_ref[...]                       # identity + conv1 input, one load
    gb = gb_ref[...]                       # (4, WC)

    # Image-boundary masks for the height halo (computed once, reused twice).
    row = jax.lax.broadcasted_iota(jnp.int32, (n_rows, wc), 0)
    not_top = (row % height) != 0
    not_bot = (row % height) != (height - 1)

    def conv3x3_bn(a32, wb_ref, gamma, beta):
        # Height halo via sublane rolls (XLU slot) + boundary select; width
        # halo is folded into the banded weight.  Single K=3*WC MXU push.
        up = jnp.where(not_top, pltpu.roll(a32, shift=1, axis=0), 0.0)
        dn = jnp.where(not_bot, pltpu.roll(a32, shift=n_rows - 1, axis=0), 0.0)
        lhs = jnp.concatenate([up, a32, dn], axis=1).astype(jnp.bfloat16)
        acc = jnp.dot(lhs, wb_ref[...], preferred_element_type=jnp.float32)

        # One-pass batch statistics; one fused (2, WC) pooling matmul folds
        # per-channel sum / sum-of-squares and broadcasts them back across the
        # W lane groups.
        sums = jnp.concatenate(
            [jnp.sum(acc, axis=0, keepdims=True),
             jnp.sum(acc * acc, axis=0, keepdims=True)], axis=0)
        stats = jnp.dot(sums, pool_ref[...], preferred_element_type=jnp.float32)
        mean = stats[0:1, :]
        var = jnp.maximum(stats[1:2, :] - mean * mean, 0.0)   # biased variance
        return (acc - mean) * jax.lax.rsqrt(var + EPS) * gamma + beta

    # conv1 + bn1 + relu
    h1 = jnp.maximum(conv3x3_bn(x32, wb1_ref, gb[0:1, :], gb[1:2, :]), 0.0)
    # conv2 + bn2 + identity add + relu (lane-dense, unmasked store)
    h2 = conv3x3_bn(h1, wb2_ref, gb[2:3, :], gb[3:4, :])
    o_ref[...] = jnp.maximum(h2 + x32, 0.0)


def banded_conv_weights(w_hwio, width, dtype=jnp.bfloat16):
    """Fold a (3,3,Cin,Cout) HWIO conv weight into one (3*W*Cin, W*Cout) matrix.

    Rows [dy*W*Cin : (dy+1)*W*Cin] map a flattened input row (w_in, cin) taken
    from image row h+dy-1 to an output row (w_out, cout); the width-direction
    zero padding is folded into the band (edge taps vanish).
    """
    kh, kw, cin, cout = w_hwio.shape
    mats = []
    for dy in range(kh):
        b = jnp.zeros((width * cin, width * cout), jnp.float32)
        for dx in range(kw):
            # Output column w_out reads input column w_in = w_out + dx - 1.
            shift = jnp.eye(width, width, k=1 - dx, dtype=jnp.float32)
            b = b + jnp.kron(shift, w_hwio[dy, dx].astype(jnp.float32))
        mats.append(b)
    return jnp.concatenate(mats, axis=0).astype(dtype)


@jax.jit
def basic_block_forward(x_nchw, params):
    """BasicBlock forward. x_nchw: (N, C, H, W) f32 -> (N, C, H, W) f32.
    Assumes stride == 1 and in_channels == out_channels (identity branch)."""
    x = jnp.transpose(x_nchw, (0, 2, 3, 1))          # -> NHWC
    n_img, height, width, chan = x.shape
    wc = width * chan
    n_rows = n_img * height
    n_px = n_img * height * width

    # Wrapper-side (once-per-weight) layout folding.
    wb1 = banded_conv_weights(params["w1"], width)
    wb2 = banded_conv_weights(params["w2"], width)
    gb = jnp.tile(jnp.concatenate([params["g1"], params["b1"],
                                   params["g2"], params["b2"]], axis=0),
                  (1, width))                         # (4, W*C)
    lane = jnp.arange(wc)
    pool = ((lane[:, None] % chan) == (lane[None, :] % chan)
            ).astype(jnp.float32) / float(n_px)

    x2d = x.reshape(n_rows, wc)                       # lane-dense activations

    kernel = functools.partial(basic_block_kernel, height=height)
    out2d = pl.pallas_call(
        kernel,
        out_shape=jax.ShapeDtypeStruct((n_rows, wc), jnp.float32),
        in_specs=[_VMEM] * 5,
        out_specs=_VMEM,
    )(x2d, wb1, wb2, gb, pool)

    out = out2d.reshape(n_img, height, width, chan)
    return jnp.transpose(out, (0, 3, 1, 2))           # back to NCHW


def reference_forward(x_nchw, params):
    """Pure-JAX reference for correctness check."""
    x = jnp.transpose(x_nchw, (0, 2, 3, 1))

    def conv(a, w):
        return jax.lax.conv_general_dilated(
            a, w, window_strides=(1, 1), padding=((1, 1), (1, 1)),
            dimension_numbers=("NHWC", "HWIO", "NHWC"))

    def bn(y, g, b):
        m = jnp.mean(y, axis=(0, 1, 2), keepdims=True)
        v = jnp.mean(jnp.square(y - m), axis=(0, 1, 2), keepdims=True)
        return (y - m) * jax.lax.rsqrt(v + EPS) * g.reshape(1, 1, 1, -1) \
            + b.reshape(1, 1, 1, -1)

    h = jax.nn.relu(bn(conv(x, params["w1"]), params["g1"], params["b1"]))
    h = bn(conv(h, params["w2"]), params["g2"], params["b2"])
    out = jax.nn.relu(h + x)
    return jnp.transpose(out, (0, 3, 1, 2))


if __name__ == "__main__":
    # Small shapes consistent with the module: stride=1, in==out channels.
    # W * C = 128 -> exactly one lane tile for the kernel-facing layout.
    N, C, H, W = 2, 8, 16, 16

    key = jax.random.PRNGKey(0)
    kx, kw1, kw2 = jax.random.split(key, 3)

    x = jax.random.normal(kx, (N, C, H, W), dtype=jnp.float32)
    params = {
        "w1": 0.1 * jax.random.normal(kw1, (3, 3, C, C), dtype=jnp.float32),
        "w2": 0.1 * jax.random.normal(kw2, (3, 3, C, C), dtype=jnp.float32),
        # PyTorch BatchNorm2d init: weight (gamma) = 1, bias (beta) = 0.
        "g1": jnp.ones((1, C), dtype=jnp.float32),
        "b1": jnp.zeros((1, C), dtype=jnp.float32),
        "g2": jnp.ones((1, C), dtype=jnp.float32),
        "b2": jnp.zeros((1, C), dtype=jnp.float32),
    }

    out = jax.block_until_ready(basic_block_forward(x, params))
    ref = jax.block_until_ready(reference_forward(x, params))

    assert out.shape == (N, C, H, W) and out.dtype == jnp.float32
    np.testing.assert_allclose(np.asarray(out), np.asarray(ref),
                               rtol=5e-2, atol=5e-2)
    print("KERNEL_OK")
</pallas_src>

<mosaic_0001>
module attributes {stable_mosaic.version = 11 : i64} {
  func.func @basic_block_kernel(%arg0: memref<32x128xf32, #tpu.memory_space<vmem>>, %arg1: memref<384x128xbf16, #tpu.memory_space<vmem>>, %arg2: memref<384x128xbf16, #tpu.memory_space<vmem>>, %arg3: memref<4x128xf32, #tpu.memory_space<vmem>>, %arg4: memref<128x128xf32, #tpu.memory_space<vmem>>, %arg5: memref<32x128xf32, #tpu.memory_space<vmem>>) attributes {dimension_semantics = [], scalar_prefetch = 0 : i64, scratch_operands = 0 : i64, tpu.core_type = #tpu.core_type<tc>} {
    %c0 = arith.constant 0 : index
    %c0_0 = arith.constant 0 : index
    %0 = vector.load %arg0[%c0, %c0_0] : memref<32x128xf32, #tpu.memory_space<vmem>>, vector<32x128xf32>
    %c0_1 = arith.constant 0 : index
    %c0_2 = arith.constant 0 : index
    %1 = vector.load %arg3[%c0_1, %c0_2] : memref<4x128xf32, #tpu.memory_space<vmem>>, vector<4x128xf32>
    %2 = tpu.iota {dimensions = array<i32: 0>} : vector<32x128xi32>
    %c16_i32 = arith.constant 16 : i32
    %c0_i32 = arith.constant 0 : i32
    %3 = arith.cmpi eq, %c16_i32, %c0_i32 : i32
    %c1_i32 = arith.constant 1 : i32
    %4 = arith.select %3, %c1_i32, %c16_i32 : i32
    %5 = vector.broadcast %4 : i32 to vector<32x128xi32>
    %6 = arith.remsi %2, %5 : vector<32x128xi32>
    %c0_i32_3 = arith.constant 0 : i32
    %7 = vector.broadcast %c0_i32_3 : i32 to vector<32x128xi32>
    %8 = arith.cmpi ne, %6, %7 : vector<32x128xi32>
    %c0_i32_4 = arith.constant 0 : i32
    %9 = vector.broadcast %c0_i32_4 : i32 to vector<32x128xi32>
    %10 = arith.cmpi slt, %6, %9 : vector<32x128xi32>
    %c0_i32_5 = arith.constant 0 : i32
    %11 = arith.cmpi slt, %4, %c0_i32_5 : i32
    %12 = vector.broadcast %11 : i1 to vector<32x128xi1>
    %13 = vector.broadcast %12 : vector<32x128xi1> to vector<32x128xi1>
    %14 = arith.xori %10, %13 : vector<32x128xi1>
    %15 = arith.andi %14, %8 : vector<32x128xi1>
    %16 = vector.broadcast %4 : i32 to vector<32x128xi32>
    %17 = arith.addi %6, %16 : vector<32x128xi32>
    %18 = arith.select %15, %17, %6 : vector<32x128xi1>, vector<32x128xi32>
    %c0_i32_6 = arith.constant 0 : i32
    %19 = vector.broadcast %c0_i32_6 : i32 to vector<32x128xi32>
    %20 = arith.cmpi ne, %18, %19 : vector<32x128xi32>
    %c16_i32_7 = arith.constant 16 : i32
    %c0_i32_8 = arith.constant 0 : i32
    %21 = arith.cmpi eq, %c16_i32_7, %c0_i32_8 : i32
    %c1_i32_9 = arith.constant 1 : i32
    %22 = arith.select %21, %c1_i32_9, %c16_i32_7 : i32
    %23 = vector.broadcast %22 : i32 to vector<32x128xi32>
    %24 = arith.remsi %2, %23 : vector<32x128xi32>
    %c0_i32_10 = arith.constant 0 : i32
    %25 = vector.broadcast %c0_i32_10 : i32 to vector<32x128xi32>
    %26 = arith.cmpi ne, %24, %25 : vector<32x128xi32>
    %c0_i32_11 = arith.constant 0 : i32
    %27 = vector.broadcast %c0_i32_11 : i32 to vector<32x128xi32>
    %28 = arith.cmpi slt, %24, %27 : vector<32x128xi32>
    %c0_i32_12 = arith.constant 0 : i32
    %29 = arith.cmpi slt, %22, %c0_i32_12 : i32
    %30 = vector.broadcast %29 : i1 to vector<32x128xi1>
    %31 = vector.broadcast %30 : vector<32x128xi1> to vector<32x128xi1>
    %32 = arith.xori %28, %31 : vector<32x128xi1>
    %33 = arith.andi %32, %26 : vector<32x128xi1>
    %34 = vector.broadcast %22 : i32 to vector<32x128xi32>
    %35 = arith.addi %24, %34 : vector<32x128xi32>
    %36 = arith.select %33, %35, %24 : vector<32x128xi1>, vector<32x128xi32>
    %c15_i32 = arith.constant 15 : i32
    %37 = vector.broadcast %c15_i32 : i32 to vector<32x128xi32>
    %38 = arith.cmpi ne, %36, %37 : vector<32x128xi32>
    %39 = vector.extract_strided_slice %1 {offsets = [0, 0], sizes = [1, 128], strides = [1, 1]} : vector<4x128xf32> to vector<1x128xf32>
    %40 = vector.extract_strided_slice %1 {offsets = [1, 0], sizes = [1, 128], strides = [1, 1]} : vector<4x128xf32> to vector<1x128xf32>
    %c1_i32_13 = arith.constant 1 : i32
    %41 = tpu.dynamic_rotate %0 by %c1_i32_13 dim 0 : vector<32x128xf32>, i32 -> vector<32x128xf32>
    %cst = arith.constant 0.000000e+00 : f32
    %42 = vector.broadcast %cst : f32 to vector<32x128xf32>
    %43 = arith.select %20, %41, %42 : vector<32x128xi1>, vector<32x128xf32>
    %c31_i32 = arith.constant 31 : i32
    %44 = tpu.dynamic_rotate %0 by %c31_i32 dim 0 : vector<32x128xf32>, i32 -> vector<32x128xf32>
    %cst_14 = arith.constant 0.000000e+00 : f32
    %45 = vector.broadcast %cst_14 : f32 to vector<32x128xf32>
    %46 = arith.select %38, %44, %45 : vector<32x128xi1>, vector<32x128xf32>
    %47 = tpu.concatenate %43, %0, %46 in 1 : vector<32x128xf32>, vector<32x128xf32>, vector<32x128xf32> -> vector<32x384xf32>
    %48 = arith.truncf %47 : vector<32x384xf32> to vector<32x384xbf16>
    %c0_15 = arith.constant 0 : index
    %c0_16 = arith.constant 0 : index
    %49 = vector.load %arg1[%c0_15, %c0_16] : memref<384x128xbf16, #tpu.memory_space<vmem>>, vector<384x128xbf16>
    %cst_17 = arith.constant dense<0.000000e+00> : vector<32x128xf32>
    %50 = tpu.matmul %48, %49, %cst_17 {dimension_numbers = #tpu.dot_dimension_numbers<[1], [0], [0], [1], [0, 0, 1, 1], [], []>} : vector<32x384xbf16>, vector<384x128xbf16>, vector<32x128xf32> -> vector<32x128xf32>
    %cst_18 = arith.constant dense<0.000000e+00> : vector<128xf32>
    %51 = vector.multi_reduction <add>, %50, %cst_18 [0] : vector<32x128xf32> to vector<128xf32>
    %52 = vector.shape_cast %51 : vector<128xf32> to vector<1x128xf32>
    %53 = arith.mulf %50, %50 : vector<32x128xf32>
    %cst_19 = arith.constant dense<0.000000e+00> : vector<128xf32>
    %54 = vector.multi_reduction <add>, %53, %cst_19 [0] : vector<32x128xf32> to vector<128xf32>
    %55 = vector.shape_cast %54 : vector<128xf32> to vector<1x128xf32>
    %56 = tpu.concatenate %52, %55 in 0 : vector<1x128xf32>, vector<1x128xf32> -> vector<2x128xf32>
    %c0_20 = arith.constant 0 : index
    %c0_21 = arith.constant 0 : index
    %57 = vector.load %arg4[%c0_20, %c0_21] : memref<128x128xf32, #tpu.memory_space<vmem>>, vector<128x128xf32>
    %cst_22 = arith.constant dense<0.000000e+00> : vector<2x128xf32>
    %58 = tpu.matmul %56, %57, %cst_22 {dimension_numbers = #tpu.dot_dimension_numbers<[1], [0], [0], [1], [0, 0, 1, 1], [], []>} : vector<2x128xf32>, vector<128x128xf32>, vector<2x128xf32> -> vector<2x128xf32>
    %59 = vector.extract_strided_slice %58 {offsets = [0, 0], sizes = [1, 128], strides = [1, 1]} : vector<2x128xf32> to vector<1x128xf32>
    %60 = vector.extract_strided_slice %58 {offsets = [1, 0], sizes = [1, 128], strides = [1, 1]} : vector<2x128xf32> to vector<1x128xf32>
    %61 = arith.mulf %59, %59 : vector<1x128xf32>
    %62 = arith.subf %60, %61 : vector<1x128xf32>
    %cst_23 = arith.constant 0.000000e+00 : f32
    %63 = vector.broadcast %cst_23 : f32 to vector<1x128xf32>
    %64 = arith.maximumf %62, %63 : vector<1x128xf32>
    %65 = vector.broadcast %59 : vector<1x128xf32> to vector<32x128xf32>
    %66 = arith.subf %50, %65 : vector<32x128xf32>
    %cst_24 = arith.constant 9.99999974E-6 : f32
    %67 = vector.broadcast %cst_24 : f32 to vector<1x128xf32>
    %68 = arith.addf %64, %67 : vector<1x128xf32>
    %69 = math.rsqrt %68 : vector<1x128xf32>
    %70 = vector.broadcast %69 : vector<1x128xf32> to vector<32x128xf32>
    %71 = arith.mulf %66, %70 : vector<32x128xf32>
    %72 = vector.broadcast %39 : vector<1x128xf32> to vector<32x128xf32>
    %73 = arith.mulf %71, %72 : vector<32x128xf32>
    %74 = vector.broadcast %40 : vector<1x128xf32> to vector<32x128xf32>
    %75 = arith.addf %73, %74 : vector<32x128xf32>
    %cst_25 = arith.constant 0.000000e+00 : f32
    %76 = vector.broadcast %cst_25 : f32 to vector<32x128xf32>
    %77 = arith.maximumf %75, %76 : vector<32x128xf32>
    %78 = vector.extract_strided_slice %1 {offsets = [2, 0], sizes = [1, 128], strides = [1, 1]} : vector<4x128xf32> to vector<1x128xf32>
    %79 = vector.extract_strided_slice %1 {offsets = [3, 0], sizes = [1, 128], strides = [1, 1]} : vector<4x128xf32> to vector<1x128xf32>
    %c1_i32_26 = arith.constant 1 : i32
    %80 = tpu.dynamic_rotate %77 by %c1_i32_26 dim 0 : vector<32x128xf32>, i32 -> vector<32x128xf32>
    %cst_27 = arith.constant 0.000000e+00 : f32
    %81 = vector.broadcast %cst_27 : f32 to vector<32x128xf32>
    %82 = arith.select %20, %80, %81 : vector<32x128xi1>, vector<32x128xf32>
    %c31_i32_28 = arith.constant 31 : i32
    %83 = tpu.dynamic_rotate %77 by %c31_i32_28 dim 0 : vector<32x128xf32>, i32 -> vector<32x128xf32>
    %cst_29 = arith.constant 0.000000e+00 : f32
    %84 = vector.broadcast %cst_29 : f32 to vector<32x128xf32>
    %85 = arith.select %38, %83, %84 : vector<32x128xi1>, vector<32x128xf32>
    %86 = tpu.concatenate %82, %77, %85 in 1 : vector<32x128xf32>, vector<32x128xf32>, vector<32x128xf32> -> vector<32x384xf32>
    %87 = arith.truncf %86 : vector<32x384xf32> to vector<32x384xbf16>
    %c0_30 = arith.constant 0 : index
    %c0_31 = arith.constant 0 : index
    %88 = vector.load %arg2[%c0_30, %c0_31] : memref<384x128xbf16, #tpu.memory_space<vmem>>, vector<384x128xbf16>
    %cst_32 = arith.constant dense<0.000000e+00> : vector<32x128xf32>
    %89 = tpu.matmul %87, %88, %cst_32 {dimension_numbers = #tpu.dot_dimension_numbers<[1], [0], [0], [1], [0, 0, 1, 1], [], []>} : vector<32x384xbf16>, vector<384x128xbf16>, vector<32x128xf32> -> vector<32x128xf32>
    %cst_33 = arith.constant dense<0.000000e+00> : vector<128xf32>
    %90 = vector.multi_reduction <add>, %89, %cst_33 [0] : vector<32x128xf32> to vector<128xf32>
    %91 = vector.shape_cast %90 : vector<128xf32> to vector<1x128xf32>
    %92 = arith.mulf %89, %89 : vector<32x128xf32>
    %cst_34 = arith.constant dense<0.000000e+00> : vector<128xf32>
    %93 = vector.multi_reduction <add>, %92, %cst_34 [0] : vector<32x128xf32> to vector<128xf32>
    %94 = vector.shape_cast %93 : vector<128xf32> to vector<1x128xf32>
    %95 = tpu.concatenate %91, %94 in 0 : vector<1x128xf32>, vector<1x128xf32> -> vector<2x128xf32>
    %c0_35 = arith.constant 0 : index
    %c0_36 = arith.constant 0 : index
    %96 = vector.load %arg4[%c0_35, %c0_36] : memref<128x128xf32, #tpu.memory_space<vmem>>, vector<128x128xf32>
    %cst_37 = arith.constant dense<0.000000e+00> : vector<2x128xf32>
    %97 = tpu.matmul %95, %96, %cst_37 {dimension_numbers = #tpu.dot_dimension_numbers<[1], [0], [0], [1], [0, 0, 1, 1], [], []>} : vector<2x128xf32>, vector<128x128xf32>, vector<2x128xf32> -> vector<2x128xf32>
    %98 = vector.extract_strided_slice %97 {offsets = [0, 0], sizes = [1, 128], strides = [1, 1]} : vector<2x128xf32> to vector<1x128xf32>
    %99 = vector.extract_strided_slice %97 {offsets = [1, 0], sizes = [1, 128], strides = [1, 1]} : vector<2x128xf32> to vector<1x128xf32>
    %100 = arith.mulf %98, %98 : vector<1x128xf32>
    %101 = arith.subf %99, %100 : vector<1x128xf32>
    %cst_38 = arith.constant 0.000000e+00 : f32
    %102 = vector.broadcast %cst_38 : f32 to vector<1x128xf32>
    %103 = arith.maximumf %101, %102 : vector<1x128xf32>
    %104 = vector.broadcast %98 : vector<1x128xf32> to vector<32x128xf32>
    %105 = arith.subf %89, %104 : vector<32x128xf32>
    %cst_39 = arith.constant 9.99999974E-6 : f32
    %106 = vector.broadcast %cst_39 : f32 to vector<1x128xf32>
    %107 = arith.addf %103, %106 : vector<1x128xf32>
    %108 = math.rsqrt %107 : vector<1x128xf32>
    %109 = vector.broadcast %108 : vector<1x128xf32> to vector<32x128xf32>
    %110 = arith.mulf %105, %109 : vector<32x128xf32>
    %111 = vector.broadcast %78 : vector<1x128xf32> to vector<32x128xf32>
    %112 = arith.mulf %110, %111 : vector<32x128xf32>
    %113 = vector.broadcast %79 : vector<1x128xf32> to vector<32x128xf32>
    %114 = arith.addf %112, %113 : vector<32x128xf32>
    %115 = arith.addf %114, %0 : vector<32x128xf32>
    %cst_40 = arith.constant 0.000000e+00 : f32
    %116 = vector.broadcast %cst_40 : f32 to vector<32x128xf32>
    %117 = arith.maximumf %115, %116 : vector<32x128xf32>
    %c0_41 = arith.constant 0 : index
    %c0_42 = arith.constant 0 : index
    %118 = vector.load %arg5[%c0_41, %c0_42] : memref<32x128xf32, #tpu.memory_space<vmem>>, vector<32x128xf32>
    tpu.vector_store %arg5[%c0_41, %c0_42], %117 {strides = array<i32>} : memref<32x128xf32, #tpu.memory_space<vmem>>, vector<32x128xf32>,
    return
  }
}

</mosaic_0001>

<bundles_post_ra>
// kernel: tile.9
= control target key start
LH: loop header
LB: loop body
LE: loop exit
PB: predicated region body
PF: predicated region fallthrough
CT: control target
= control target key end

     0   :  { %vm6_vm0 = vcmask 1043458   ;;  %s11_s6 = smov 3  ;;  %s14_s7 = smov 12  ;;  %vm8_vm1 = vcmask 64512   ;;  %vm20_vm2 = vcmask 1048512   ;;  %vm32_vm3 = vcmask 982912   ;;  %s383_s0 = inlined_call_operand.vmem [shape: f32[4,16,8], index: 0, kind: input, shape index: {}]   ;;  %s384_s1 = inlined_call_operand.vmem [shape: f32[4,128], index: 1, kind: output, shape index: {}]  }
   0x1   :  { %v198_v0 = vld [vmem:[%s383_s0 + $0xf] ss:$16 sm:%s11_s6]   ;;  %s35_s12 = smov 3  ;;  %s38_s15 = smov 12  ;;  %vm44_vm4 = vcmask 917312   ;;  %vm56_vm5 = vcmask 851712  }
   0x2   :  { %v199_v1 = vld [vmem:[%s383_s0 + $0xf] ss:$16 sm:%s14_s7]   ;;  %v202_v3 = vld [vmem:[%s383_s0 + $0xd] ss:$16 sm:%s35_s12]   ;;  %s243_s16 = smov 120   ;;  %s23_s19 = smov 3 }
   0x3   :  { %v17_v2 = vsel %vm6_vm0, %v199_v1, %v198_v0  ;;  %v203_v4 = vld [vmem:[%s383_s0 + $0xd] ss:$16 sm:%s38_s15]   ;;  %s26_s20 = smov 12  ;;  %v200_v6 = vld [vmem:[%s383_s0 + $0xe] ss:$16 sm:%s23_s19]   ;;  %s47_s25 = smov 3 }
   0x4   :  { %18 = vrot.lane.b32.xlu0 %v17_v2, %s243_s16  ;;  %v41_v5 = vsel %vm6_vm0, %v203_v4, %v202_v3  ;;  %v201_v7 = vld [vmem:[%s383_s0 + $0xe] ss:$16 sm:%s26_s20]   ;;  %s244_s26 = smov 104   ;;  %s50_s29 = smov 12  ;;  %vm68_vm6 = vcmask 786112   ;;  %vm80_vm7 = vcmask 720512  }
   0x5   :  { %42 = vrot.lane.b32.xlu1 %v41_v5, %s244_s26  ;;  %v29_v8 = vsel %vm6_vm0, %v201_v7, %v200_v6  ;;  %v204_v9 = vld [vmem:[%s383_s0 + $0xc] ss:$16 sm:%s47_s25]   ;;  %s59_s3 = smov 3  ;;  %s62_s4 = smov 12  ;;  %vm92_vm8 = vcmask 654912   ;;  %vm104_vm9 = vcmask 589312  }
   0x6   :  { %v205_v10 = vld [vmem:[%s383_s0 + $0xc] ss:$16 sm:%s50_s29]   ;;  %s245_s5 = smov 112   ;;  %v206_v12 = vld [vmem:[%s383_s0 + $0xb] ss:$16 sm:%s59_s3]   ;;  %s71_s8 = smov 3 }
   0x7   :  { %v53_v11 = vsel %vm6_vm0, %v205_v10, %v204_v9  ;;  %v207_v13 = vld [vmem:[%s383_s0 + $0xb] ss:$16 sm:%s62_s4]   ;;  %v208_v14 = vld [vmem:[%s383_s0 + $0xa] ss:$16 sm:%s71_s8]   ;;  %s74_s13 = smov 12  ;;  %s246_s14 = smov 96  }
   0x8   :  { %30 = vrot.lane.b32.xlu0 %v29_v8, %s245_s5  ;;  %v65_v15 = vsel %vm6_vm0, %v207_v13, %v206_v12  ;;  %v209_v16 = vld [vmem:[%s383_s0 + $0xa] ss:$16 sm:%s74_s13]   ;;  %s83_s17 = smov 3  ;;  %s86_s18 = smov 12  ;;  %vm116_vm10 = vcmask 523712   ;;  %vm128_vm11 = vcmask 458112  }
   0x9   :  { %54 = vrot.lane.b32.xlu1 %v53_v11, %s246_s14  ;;  %v77_v17 = vsel %vm6_vm0, %v209_v16, %v208_v14  ;;  %v210_v18 = vld [vmem:[%s383_s0 + $0x9] ss:$16 sm:%s83_s17]   ;;  %s95_s23 = smov 3  ;;  %s247_s24 = smov 88   ;;  %vm140_vm12 = vcmask 392512   ;;  %vm152_vm13 = vcmask 326912  }
   0xa   :  { %v211_v19 = vld [vmem:[%s383_s0 + $0x9] ss:$16 sm:%s86_s18]   ;;  %v212_v20 = vld [vmem:[%s383_s0 + $0x8] ss:$16 sm:%s95_s23]   ;;  %s98_s27 = smov 12  ;;  %s107_s30 = smov 3 }
   0xb   :  { %v89_v21 = vsel %vm6_vm0, %v211_v19, %v210_v18  ;;  %v213_v22 = vld [vmem:[%s383_s0 + $0x8] ss:$16 sm:%s98_s27]   ;;  %s110_s2 = smov 12  ;;  %s248_s3 = smov 80   ;;  %v214_v23 = vld [vmem:[%s383_s0 + $0x7] ss:$16 sm:%s107_s30]  }
   0xc   :  { %66 = vrot.lane.b32.xlu0 %v65_v15, %s247_s24  ;;  %s119_s6 = smov 3  ;;  %v101_v24 = vsel %vm6_vm0, %v213_v22, %v212_v20  ;;  %v215_v25 = vld [vmem:[%s383_s0 + $0x7] ss:$16 sm:%s110_s2]   ;;  %s122_s11 = smov 12  ;;  %vm164_vm14 = vcmask 261312   ;;  %vm176_vm15 = vcmask 195712  }
   0xd   :  { %78 = vrot.lane.b32.xlu1 %v77_v17, %s248_s3  ;;  %v216_v26 = vld [vmem:[%s383_s0 + $0x6] ss:$16 sm:%s119_s6]   ;;  %s249_s12 = smov 72   ;;  %s131_s15 = smov 3  ;;  %v113_v28 = vsel %vm6_vm0, %v215_v25, %v214_v23 }
   0xe   :  { %v217_v27 = vld [vmem:[%s383_s0 + $0x6] ss:$16 sm:%s122_s11]   ;;  %s134_s16 = smov 12  ;;  %v218_v29 = vld [vmem:[%s383_s0 + $0x5] ss:$16 sm:%s131_s15]   ;;  %s143_s19 = smov 3 }
   0xf   :  { %s250_s20 = smov 64   ;;  %v219_v30 = vld [vmem:[%s383_s0 + $0x5] ss:$16 sm:%s134_s16]   ;;  %s146_s23 = smov 12  ;;  %v125_v31 = vsel %vm6_vm0, %v217_v27, %v216_v26  ;;  %v220_v32 = vld [vmem:[%s383_s0 + $0x4] ss:$16 sm:%s143_s19]  }
  0x10   :  { %90 = vrot.lane.b32.xlu0 %v89_v21, %s249_s12  ;;  %s155_s26 = smov 3  ;;  %s158_s27 = smov 12  ;;  %v221_v33 = vld [vmem:[%s383_s0 + $0x4] ss:$16 sm:%s146_s23]   ;;  %v137_v34 = vsel %vm6_vm0, %v219_v30, %v218_v29 }
  0x11   :  { %102 = vrot.lane.b32.xlu1 %v101_v24, %s250_s20  ;;  %s251_s28 = smov 56   ;;  %s167_s2 = smov 3  ;;  %v222_v35 = vld [vmem:[%s383_s0 + $0x3] ss:$16 sm:%s155_s26]   ;;  %v149_v37 = vsel %vm6_vm0, %v221_v33, %v220_v32 }
  0x12   :  { %s170_s5 = smov 12  ;;  %s252_s6 = smov 48   ;;  %v223_v36 = vld [vmem:[%s383_s0 + $0x3] ss:$16 sm:%s158_s27]   ;;  %v224_v38 = vld [vmem:[%s383_s0 + $0x2] ss:$16 sm:%s167_s2]  }
  0x13   :  { %s179_s9 = smov 3  ;;  %v225_v39 = vld [vmem:[%s383_s0 + $0x2] ss:$16 sm:%s170_s5]   ;;  %s182_s14 = smov 12  ;;  %v161_v41 = vsel %vm6_vm0, %v223_v36, %v222_v35 }
  0x14   :  { %114 = vrot.lane.b32.xlu0 %v113_v28, %s251_s28  ;;  %s2_s15 = smov 3  ;;  %s253_s16 = smov 40   ;;  %v226_v42 = vld [vmem:[%s383_s0 + $0x1] ss:$16 sm:%s179_s9]   ;;  %v173_v46 = vsel %vm6_vm0, %v225_v39, %v224_v38 }
  0x15   :  { %126 = vrot.lane.b32.xlu1 %v125_v31, %s252_s6  ;;  %v3_v40 = vld [vmem:[%s383_s0] ss:$16 sm:%s2_s15]   ;;  %s4_s19 = smov 12  ;;  %s254_s24 = smov 32  }
  0x16   :  { %v5_v43 = vld [vmem:[%s383_s0] ss:$16 sm:%s4_s19]   ;;  %v227_v44 = vld [vmem:[%s383_s0 + $0x1] ss:$16 sm:%s182_s14]   ;;  %s255_s0 = smov 24   ;;  %s256_s27 = smov 16  }
  0x17   :  { %v7_v45 = vsel %vm6_vm0, %v5_v43, %v3_v40  ;;  %v185_v47 = vsel %vm6_vm0, %v227_v44, %v226_v42  ;;  %s257_s28 = smov 8   ;;  %vm188_vm0 = vcmask 130112  }
  0x18   :  { %138 = vrot.lane.b32.xlu0 %v137_v34, %s253_s16  ;;  %9 = vst.msk [vmem:[#allocation0] sm:$0xf] %vm8_vm1, %v7_v45  }
  0x19   :  { %150 = vrot.lane.b32.xlu1 %v149_v37, %s254_s24 }
  0x1c   :  { %162 = vrot.lane.b32.xlu0 %v161_v41, %s255_s0 }
  0x1d   :  { %174 = vrot.lane.b32.xlu1 %v173_v46, %s256_s27 }
  0x20   :  { %186 = vrot.lane.b32.xlu0 %v185_v47, %s257_s28 }
  0x76   :  { %v19_v48 = vpop.permute.xlu0 %18  }
  0x77   :  { %21 = vst.msk [vmem:[#allocation0] sm:$0xf] %vm20_vm2, %v19_v48   ;;  %v43_v49 = vpop.permute.xlu1 %42  }
  0x7a   :  { %v31_v50 = vpop.permute.xlu0 %30  }
  0x7b   :  { %33 = vst.msk [vmem:[#allocation0] sm:$0xf] %vm32_vm3, %v31_v50   ;;  %v55_v51 = vpop.permute.xlu1 %54  }
  0x7c   :  { %45 = vst.msk [vmem:[#allocation0] sm:$0xf] %vm44_vm4, %v43_v49  }
  0x7d   :  { %57 = vst.msk [vmem:[#allocation0] sm:$0xf] %vm56_vm5, %v55_v51  }
  0x7e   :  { %v67_v52 = vpop.permute.xlu0 %66  }
  0x7f   :  { %69 = vst.msk [vmem:[#allocation0] sm:$0xf] %vm68_vm6, %v67_v52   ;;  %v79_v53 = vpop.permute.xlu1 %78  }
  0x80   :  { %81 = vst.msk [vmem:[#allocation0] sm:$0xf] %vm80_vm7, %v79_v53  }
  0x82   :  { %v91_v54 = vpop.permute.xlu0 %90  }
  0x83   :  { %93 = vst.msk [vmem:[#allocation0] sm:$0xf] %vm92_vm8, %v91_v54   ;;  %v103_v55 = vpop.permute.xlu1 %102  }
  0x84   :  { %105 = vst.msk [vmem:[#allocation0] sm:$0xf] %vm104_vm9, %v103_v55  }
  0x86   :  { %v115_v56 = vpop.permute.xlu0 %114  }
  0x87   :  { %117 = vst.msk [vmem:[#allocation0] sm:$0xf] %vm116_vm10, %v115_v56   ;;  %v127_v57 = vpop.permute.xlu1 %126  }
  0x88   :  { %129 = vst.msk [vmem:[#allocation0] sm:$0xf] %vm128_vm11, %v127_v57  }
  0x8a   :  { %v139_v58 = vpop.permute.xlu0 %138  }
  0x8b   :  { %141 = vst.msk [vmem:[#allocation0] sm:$0xf] %vm140_vm12, %v139_v58   ;;  %v151_v59 = vpop.permute.xlu1 %150  }
  0x8c   :  { %153 = vst.msk [vmem:[#allocation0] sm:$0xf] %vm152_vm13, %v151_v59  }
  0x8e   :  { %v163_v60 = vpop.permute.xlu0 %162  }
  0x8f   :  { %165 = vst.msk [vmem:[#allocation0] sm:$0xf] %vm164_vm14, %v163_v60   ;;  %v175_v61 = vpop.permute.xlu1 %174  }
  0x90   :  { %177 = vst.msk [vmem:[#allocation0] sm:$0xf] %vm176_vm15, %v175_v61  }
  0x92   :  { %v187_v62 = vpop.permute.xlu0 %186  }
  0x93   :  { %189 = vst.msk [vmem:[#allocation0] sm:$0xf] %vm188_vm0, %v187_v62  }
  0x9a   :  { %v194_v63 = vld [vmem:[#allocation0] sm:$0xf] }
  0x9b   :  { %197 = vst [vmem:[%s384_s1] sm:$0xf] %v194_v63 }

// kernel: basic_block_forward.1
= control target key start
LH: loop header
LB: loop body
LE: loop exit
PB: predicated region body
PF: predicated region fallthrough
CT: control target
= control target key end

     0   :  { %v26_v8 = vlaneseq  ;;  %vm1379_vm3 = vmmov 1   ;;  %vm1381_vm11 = vmmov 0   ;;  %vm431_vm12 = vcmask 1040384   ;;  %s1883_s1 = inlined_call_operand.vmem [shape: bf16[384,128], index: 1, kind: input, shape index: {}]   ;;  %s1884_s0 = inlined_call_operand.vmem [shape: f32[32,128], index: 0, kind: input, shape index: {}]   ;;  %s1885_s4 = inlined_call_operand.vmem [shape: f32[128,128], index: 4, kind: input, shape index: {}]   ;;  %s1886_s2 = inlined_call_operand.vmem [shape: bf16[384,128], index: 2, kind: input, shape index: {}]   ;;  %s1887_s3 = inlined_call_operand.vmem [shape: f32[4,128], index: 3, kind: input, shape index: {}]   ;;  %s1888_s5 = inlined_call_operand.vmem [shape: f32[32,128], index: 5, kind: output, shape index: {}]  }
   0x1   :  { %v1327_v0 = vld [vmem:[%s1883_s1 + $0x78] sm:$0xff]   ;;  %v1330_v3 = vld [vmem:[%s1883_s1 + $0x70] sm:$0xff]   ;;  %v1333_v6 = vld [vmem:[%s1883_s1 + $0x68] sm:$0xff]  }
   0x2   :  { %v1328_v1 = vld [vmem:[%s1883_s1 + $0xb8] sm:$0xff]   ;;  %1104 = vmatprep.subr.bf16.mxu0 %v1327_v0  ;;  %v1331_v4 = vld [vmem:[%s1883_s1 + $0xb0] sm:$0xff]   ;;  %v1334_v7 = vld [vmem:[%s1883_s1 + $0xa8] sm:$0xff]   ;;  %v1448_v13 = vshrl.u32 %v26_v8, 7  ;;  %v1380_v0 = vmov 0.0  }
   0x3   :  { %v1329_v2 = vld [vmem:[%s1883_s1 + $0x38] sm:$0xff]   ;;  %1214 = vmatprep.subr.bf16.mxu1 %v1328_v1  ;;  %v1332_v5 = vld [vmem:[%s1883_s1 + $0x30] sm:$0xff]   ;;  %v1335_v9 = vld [vmem:[%s1883_s1 + $0x28] sm:$0xff]  }
   0x4   :  { %1105 = vmatpush3.bf16.msra.mxu0 %v1329_v2  ;;  %1215 = vmatpush3.bf16.msra.mxu1 %v1328_v1  ;;  %v1336_v10 = vld [vmem:[%s1883_s1 + $0x60] sm:$0xff]   ;;  %v1339_v14 = vld [vmem:[%s1883_s1 + $0x58] sm:$0xff]   ;;  %v28_v17 = vadd.s32 8, %v1448_v13  ;;  %v1342_v18 = vld [vmem:[%s1883_s1 + $0x50] sm:$0xff]   ;;  %v30_v23 = vadd.s32 24, %v1448_v13  ;;  %vm104_vm0 = vcmp.lt.s32.totalorder %v1448_v13, 7 }
   0x5   :  { %1106 = vmatprep.subr.bf16.mxu0 %v1330_v3  ;;  %1216 = vmatprep.subr.bf16.mxu1 %v1331_v4  ;;  %v1337_v11 = vld [vmem:[%s1883_s1 + $0xa0] sm:$0xff]   ;;  %v1340_v15 = vld [vmem:[%s1883_s1 + $0x98] sm:$0xff]   ;;  %v1343_v19 = vld [vmem:[%s1883_s1 + $0x90] sm:$0xff]   ;;  %v35_v26 = vand.u32 15, %v1448_v13  ;;  %vm91_vm2 = vcmp.lt.s32.totalorder %v1448_v13, 1  ;;  %v29_v51 = vadd.s32 16, %v1448_v13 }
   0x6   :  { %v1338_v12 = vld [vmem:[%s1883_s1 + $0x20] sm:$0xff]   ;;  %v1341_v16 = vld [vmem:[%s1883_s1 + $0x18] sm:$0xff]   ;;  %v1344_v20 = vld [vmem:[%s1883_s1 + $0x10] sm:$0xff]   ;;  %v42_v21 = vand.u32 15, %v28_v17  ;;  %v56_v31 = vand.u32 15, %v30_v23 }
   0x7   :  { %v1345_v22 = vld [vmem:[%s1883_s1 + $0x48] sm:$0xff]   ;;  %v1484_v27 = vld [vmem:[%s1884_s0] sm:$0xff]  ;;  %v1494_v29 = vld [vmem:[%s1884_s0 + $0x18] sm:$0xff]  ;;  %vm79_vm5 = vcmp.ne.s32.totalorder %v35_v26, 0  ;;  %v49_v59 = vand.u32 15, %v29_v51 }
   0x8   :  { %1107 = vmatpush3.bf16.msra.mxu0 %v1332_v5  ;;  %1217 = vmatpush3.bf16.msra.mxu1 %v1331_v4  ;;  %v1346_v24 = vld [vmem:[%s1883_s1 + $0x88] sm:$0xff]   ;;  %vm1496_vm1 = vcmp.ne.s32.totalorder %v42_v21, 15  ;;  %v1348_v32 = vld [vmem:[%s1883_s1 + $0x40] sm:$0xff]   ;;  %v87_v34 = vrot.slane %v1484_v27, 7  ;;  %v1514_v37 = vld [vmem:[%s1884_s0 + $0x10] sm:$0xff]  ;;  %v100_v38 = vrot.slane %v1484_v27, 1 }
   0x9   :  { %1108 = vmatprep.subr.bf16.mxu0 %v1333_v6  ;;  %1218 = vmatprep.subr.bf16.mxu1 %v1334_v7  ;;  %v1347_v25 = vld [vmem:[%s1883_s1 + $0x8] sm:$0xff]   ;;  %v1349_v33 = vld [vmem:[%s1883_s1 + $0x80] sm:$0xff]   ;;  %v102_v40 = vrot.slane %v1514_v37, 1  ;;  %v90_v41 = vrot.slane %v1494_v29, 7  ;;  %v103_v42 = vrot.slane %v1494_v29, 1  ;;  %vm1533_vm4 = vmpackc.low %vm1496_vm1, %vm1379_vm3  ;;  %vm86_vm6 = vcmp.ne.s32.totalorder %v56_v31, 15 }
   0xa   :  { %v1489_v28 = vld [vmem:[%s1884_s0 + $0x8] sm:$0xff]  ;;  %v1350_v44 = vld [vmem:[%s1883_s1] sm:$0xff]   ;;  %vm1547_vm7 = vmpackc.low %vm1379_vm3, %vm79_vm5  ;;  %v117_v57 = vpack.c.bf16 %v1494_v29, %v1514_v37  ;;  %v89_v58 = vrot.slane %v1514_v37, 7  ;;  %vm81_vm9 = vcmp.ne.s32.totalorder %v49_v59, 0 }
   0xb   :  { %v88_v35 = vrot.slane %v1489_v28, 7  ;;  %v114_v36 = vpack.c.bf16 %v1489_v28, %v1484_v27  ;;  %v101_v39 = vrot.slane %v1489_v28, 1  ;;  %v95_v48 = vsel %vm91_vm2, %v90_v41, %v87_v34  ;;  %vm1552_vm8 = vmpackc.low %vm86_vm6, %vm1379_vm3  ;;  %v1578_v1 = vld [vmem:[%s1885_s4 + $0x78] sm:$0xff]  ;;  %v1585_v2 = vld [vmem:[%s1885_s4 + $0x70] sm:$0xff] }
   0xc   :  { %1109 = vmatpush3.bf16.msra.mxu0 %v1335_v9  ;;  %1219 = vmatpush3.bf16.msra.mxu1 %v1334_v7  ;;  %v105_v50 = vsel %vm104_vm0, %v102_v40, %v103_v42  ;;  %v108_v52 = vsel %vm104_vm0, %v103_v42, %v100_v38  ;;  %v92_v60 = vsel %vm91_vm2, %v89_v58, %v90_v41  ;;  %vm1568_vm10 = vmpackc.low %vm1379_vm3, %vm81_vm9  ;;  %v1592_v3 = vld [vmem:[%s1885_s4 + $0x68] sm:$0xff]  ;;  %v1599_v4 = vld [vmem:[%s1885_s4 + $0x60] sm:$0xff] }
   0xd   :  { %1110 = vmatprep.subr.bf16.mxu0 %v1336_v10  ;;  %1220 = vmatprep.subr.bf16.mxu1 %v1337_v11  ;;  %v94_v43 = vsel %vm91_vm2, %v87_v34, %v88_v35  ;;  %v106_v45 = vsel %vm104_vm0, %v101_v39, %v102_v40  ;;  %v107_v46 = vsel %vm104_vm0, %v100_v38, %v101_v39  ;;  %v1606_v5 = vld [vmem:[%s1885_s4 + $0x58] sm:$0xff]  ;;  %v1613_v6 = vld [vmem:[%s1885_s4 + $0x50] sm:$0xff]  ;;  %v1620_v7 = vld [vmem:[%s1885_s4 + $0x48] sm:$0xff] }
   0xe   :  { %343 = vmatprep.mubr.bf16.mxu0 %v114_v36  ;;  %v1063_v49 = vpack.c.bf16 %v106_v45, %v107_v46  ;;  %v1057_v54 = vpack.c.bf16 %v94_v43, %v95_v48  ;;  %v1066_v55 = vpack.c.bf16 %v108_v52, %v105_v50  ;;  %v93_v61 = vsel %vm91_vm2, %v88_v35, %v89_v58  ;;  %v1627_v8 = vld [vmem:[%s1885_s4 + $0x40] sm:$0xff]  ;;  %v1634_v9 = vld [vmem:[%s1885_s4 + $0x38] sm:$0xff]  ;;  %v1641_v10 = vld [vmem:[%s1885_s4 + $0x30] sm:$0xff] }
   0xf   :  { %v1060_v62 = vpack.c.bf16 %v92_v60, %v93_v61  ;;  %v1683_v17 = vld [vmem:[%s1885_s4] sm:$0xff] }
  0x10   :  { %1111 = vmatpush3.bf16.msra.mxu0 %v1338_v12  ;;  %1221 = vmatpush3.bf16.msra.mxu1 %v1337_v11  ;;  %v1648_v11 = vld [vmem:[%s1885_s4 + $0x28] sm:$0xff]  ;;  %v1655_v12 = vld [vmem:[%s1885_s4 + $0x20] sm:$0xff] }
  0x11   :  { %1112 = vmatprep.subr.bf16.mxu0 %v1339_v14  ;;  %1222 = vmatprep.subr.bf16.mxu1 %v1340_v15  ;;  %v1661_v14 = vld [vmem:[%s1885_s4 + $0x18] sm:$0xff] }
  0x12   :  { %1230 = vmatprep.mubr.msk.bf16.mxu1 %vm1533_vm4, %v1063_v49 }
  0x14   :  { %1113 = vmatpush3.bf16.msra.mxu0 %v1341_v16  ;;  %1223 = vmatpush3.bf16.msra.mxu1 %v1340_v15  ;;  %v1667_v15 = vld [vmem:[%s1885_s4 + $0x10] sm:$0xff]  ;;  %v1676_v16 = vld [vmem:[%s1885_s4 + $0x8] sm:$0xff] }
  0x15   :  { %1114 = vmatprep.subr.bf16.mxu0 %v1342_v18  ;;  %1224 = vmatprep.subr.bf16.mxu1 %v1343_v19 }
  0x18   :  { %1115 = vmatpush3.bf16.msra.mxu0 %v1344_v20  ;;  %1225 = vmatpush3.bf16.msra.mxu1 %v1343_v19 }
  0x19   :  { %1116 = vmatprep.subr.bf16.mxu0 %v1345_v22  ;;  %1226 = vmatprep.subr.bf16.mxu1 %v1346_v24 }
  0x1c   :  { %1117 = vmatpush3.bf16.msra.mxu0 %v1347_v25  ;;  %1227 = vmatpush3.bf16.msra.mxu1 %v1346_v24 }
  0x1d   :  { %1118 = vmatprep.subr.bf16.mxu0 %v1348_v32  ;;  %1228 = vmatprep.subr.bf16.mxu1 %v1349_v33 }
  0x20   :  { %1119 = vmatpush3.bf16.msra.mxu0 %v1350_v44  ;;  %1229 = vmatpush3.bf16.msra.mxu1 %v1349_v33 }
  0x21   :  { %1234 = vmatprep.subr.mxu0 %v1380_v0 }
  0x23   :  { %1058 = vmatmul.mubr.msk.bf16.vlgmr.msra.gmra.mxu0 %vm1547_vm7, %v1057_v54  ;;  %1231 = vmatmul.mubr.msk.bf16.vlgmr.msra.gmra.mxu1 %vm1552_vm8, %v1066_v55 }
  0x24   :  { %351 = vmatprep.mubr.bf16.mxu0 %v117_v57  ;;  %1235 = vmatpush3.msra.mxu0 %v1578_v1 }
  0x25   :  { %1236 = vmatprep.subr.mxu0 %v1380_v0 }
  0x26   :  { %1237 = vmatpush3.msra.mxu0 %v1585_v2 }
  0x27   :  { %1238 = vmatprep.subr.mxu0 %v1380_v0 }
  0x28   :  { %1239 = vmatpush3.msra.mxu0 %v1592_v3 }
  0x29   :  { %1240 = vmatprep.subr.mxu0 %v1380_v0 }
  0x2a   :  { %1241 = vmatpush3.msra.mxu0 %v1599_v4 }
  0x2b   :  { %1061 = vmatmul.mubr.msk.bf16.gmra.mxu0 %vm1568_vm10, %v1060_v62  ;;  %1242 = vmatprep.subr.mxu0 %v1380_v0 }
  0x2c   :  { %1243 = vmatpush3.msra.mxu0 %v1606_v5  ;;  %1266 = vmatprep.mubr.msk.f32.mxu0 %vm1381_vm11, %v1380_v0 }
  0x2d   :  { %1244 = vmatprep.subr.mxu0 %v1380_v0 }
  0x2e   :  { %1245 = vmatpush3.msra.mxu0 %v1613_v6 }
  0x2f   :  { %1246 = vmatprep.subr.mxu0 %v1380_v0 }
  0x30   :  { %1247 = vmatpush3.msra.mxu0 %v1620_v7 }
  0x31   :  { %1248 = vmatprep.subr.mxu0 %v1380_v0 }
  0x32   :  { %1249 = vmatpush3.msra.mxu0 %v1627_v8 }
  0x33   :  { %1250 = vmatprep.subr.mxu0 %v1380_v0 }
  0x34   :  { %1251 = vmatpush3.msra.mxu0 %v1634_v9 }
  0x35   :  { %1252 = vmatprep.subr.mxu0 %v1380_v0 }
  0x36   :  { %1253 = vmatpush3.msra.mxu0 %v1641_v10 }
  0x37   :  { %1254 = vmatprep.subr.mxu0 %v1380_v0 }
  0x38   :  { %1255 = vmatpush3.msra.mxu0 %v1648_v11 }
  0x39   :  { %1256 = vmatprep.subr.mxu0 %v1380_v0 }
  0x3a   :  { %1257 = vmatpush3.msra.mxu0 %v1655_v12 }
  0x3b   :  { %1258 = vmatprep.subr.mxu0 %v1380_v0 }
  0x3c   :  { %1259 = vmatpush3.msra.mxu0 %v1661_v14 }
  0x3d   :  { %1260 = vmatprep.subr.mxu0 %v1380_v0 }
  0x3e   :  { %1261 = vmatpush3.msra.mxu0 %v1667_v15 }
  0x3f   :  { %1262 = vmatprep.subr.mxu0 %v1380_v0 }
  0x40   :  { %1263 = vmatpush3.msra.mxu0 %v1676_v16 }
  0x41   :  { %1264 = vmatprep.subr.mxu0 %v1380_v0 }
  0x42   :  { %1265 = vmatpush3.msra.mxu0 %v1683_v17 }
  0xe3   :  { %v1120_v18 = vpop.f32.mrf.mxu0  ;;  %v1232_v19 = vpop.f32.mrf.mxu1 }
  0xe5   :  { %v1121_v20 = vpop.f32.mrf.mxu0  ;;  %v394_v21 = vpop.f32.mrf.mxu1 }
  0xe6   :  { %v1122_v25 = vadd.f32 %v1121_v20, %v1120_v18 }
  0xe7   :  { %v1123_v22 = vpop.f32.mrf.mxu0  ;;  %v1233_v23 = vpop.f32.mrf.mxu1 }
  0xe8   :  { %v1690_v34 = vadd.f32 %v1122_v25, %v394_v21  ;;  %v1353_v25 = vld [vmem:[%s1886_s2 + $0xb8] sm:$0xff]  }
  0xe9   :  { %v1124_v24 = vpop.f32.mrf.mxu0  ;;  %v397_v30 = vpop.f32.mrf.mxu1  ;;  %1269 = vmatprep.subr.bf16.mxu0 %v1353_v25 }
  0xea   :  { %v1125_v26 = vadd.f32 %v1124_v24, %v1123_v22  ;;  %v418_v41 = vmul.f32 %v1690_v34, %v1690_v34  ;;  %v1352_v24 = vld [vmem:[%s1886_s2 + $0x38] sm:$0xff]  }
  0xeb   :  { %v1126_v31 = vpop.f32.mrf.mxu0 }
  0xec   :  { %v1688_v32 = vadd.f32 %v1125_v26, %v397_v30  ;;  %v1354_v26 = vld [vmem:[%s1886_s2 + $0x70] sm:$0xff]  }
  0xed   :  { %v1127_v33 = vpop.f32.mrf.mxu0  ;;  %v1355_v30 = vld [vmem:[%s1886_s2 + $0x30] sm:$0xff]  }
  0xee   :  { %v1128_v35 = vadd.f32 %v1127_v33, %v1126_v31  ;;  %v419_v38 = vmul.f32 %v1688_v32, %v1688_v32  ;;  %v409_v42 = vadd.f32 %v1688_v32, %v1690_v34  ;;  %v1356_v31 = vld [vmem:[%s1886_s2 + $0xb0] sm:$0xff]   ;;  %v1357_v33 = vld [vmem:[%s1886_s2 + $0x68] sm:$0xff]  }
  0xef   :  { %v1129_v36 = vpop.f32.mrf.mxu0 }
  0xf0   :  { %v1694_v39 = vadd.f32 %v1232_v19, %v1128_v35  ;;  %v422_v45 = vadd.f32 %v419_v38, %v418_v41  ;;  %v1358_v35 = vld [vmem:[%s1886_s2 + $0x28] sm:$0xff]   ;;  %v1360_v38 = vld [vmem:[%s1886_s2 + $0x60] sm:$0xff]  }
  0xf1   :  { %v1130_v40 = vpop.f32.mrf.mxu0  ;;  %v1362_v41 = vld [vmem:[%s1886_s2 + $0xa0] sm:$0xff]  }
  0xf2   :  { %v420_v43 = vmul.f32 %v1694_v39, %v1694_v39  ;;  %v1131_v44 = vadd.f32 %v1130_v40, %v1129_v36  ;;  %v410_v46 = vadd.f32 %v409_v42, %v1694_v39  ;;  %v1359_v36 = vld [vmem:[%s1886_s2 + $0xa8] sm:$0xff]   ;;  %v1361_v40 = vld [vmem:[%s1886_s2 + $0x20] sm:$0xff]   ;;  %v1363_v42 = vld [vmem:[%s1886_s2 + $0x58] sm:$0xff]  }
  0xf4   :  { %v1703_v48 = vadd.f32 %v1233_v23, %v1131_v44  ;;  %v423_v49 = vadd.f32 %v422_v45, %v420_v43  ;;  %v1351_v23 = vld [vmem:[%s1886_s2 + $0x78] sm:$0xff]   ;;  %v1366_v45 = vld [vmem:[%s1886_s2 + $0x50] sm:$0xff]  }
  0xf5   :  { %1159 = vmatprep.subr.bf16.mxu1 %v1351_v23  ;;  %v1364_v43 = vld [vmem:[%s1886_s2 + $0x18] sm:$0xff]   ;;  %v1792_v23 = vsub.s32 1, %v1448_v13 }
  0xf6   :  { %v411_v50 = vadd.f32 %v410_v46, %v1703_v48  ;;  %v421_v51 = vmul.f32 %v1703_v48, %v1703_v48  ;;  %1160 = vmatpush3.bf16.msra.mxu1 %v1352_v24  ;;  %v1365_v44 = vld [vmem:[%s1886_s2 + $0x98] sm:$0xff]   ;;  %v1367_v46 = vld [vmem:[%s1886_s2 + $0x10] sm:$0xff]  }
  0xf7   :  { %1161 = vmatprep.subr.bf16.mxu1 %v1354_v26 }
  0xf8   :  { %v412_v52 = vrot.slane %v411_v50, 4  ;;  %v424_v54 = vadd.f32 %v423_v49, %v421_v51  ;;  %v1368_v49 = vld [vmem:[%s1886_s2 + $0x90] sm:$0xff]   ;;  %v1371_v51 = vld [vmem:[%s1886_s2 + $0x88] sm:$0xff]  }
  0xfa   :  { %v413_v55 = vadd.f32 %v412_v52, %v411_v50  ;;  %v425_v57 = vrot.slane %v424_v54, 4  ;;  %1162 = vmatpush3.bf16.msra.mxu1 %v1355_v30  ;;  %v1369_v50 = vld [vmem:[%s1886_s2 + $0x48] sm:$0xff]  }
  0xfb   :  { %1163 = vmatprep.subr.bf16.mxu1 %v1357_v33  ;;  %v1370_v52 = vld [vmem:[%s1886_s2 + $0x8] sm:$0xff]  }
  0xfc   :  { %v414_v58 = vrot.slane %v413_v55, 2  ;;  %v426_v59 = vadd.f32 %v425_v57, %v424_v54  ;;  %v1372_v54 = vld [vmem:[%s1886_s2 + $0x40] sm:$0xff]  }
  0xfd   :  { %v1374_v57 = vld [vmem:[%s1886_s2 + $0x80] sm:$0xff]  }
  0xfe   :  { %v415_v60 = vadd.f32 %v414_v58, %v413_v55  ;;  %v427_v61 = vrot.slane %v426_v59, 2  ;;  %1164 = vmatpush3.bf16.msra.mxu1 %v1358_v35  ;;  %v1373_v55 = vld [vmem:[%s1886_s2] sm:$0xff]  }
  0xff   :  { %1165 = vmatprep.subr.bf16.mxu1 %v1360_v38 }
 0x100   :  { %v416_v62 = vrot.slane %v415_v60, 1  ;;  %v428_v18 = vadd.f32 %v427_v61, %v426_v59 }
 0x102   :  { %v429_v19 = vrot.slane %v428_v18, 1  ;;  %v417_v20 = vadd.f32 %v416_v62, %v415_v60  ;;  %1166 = vmatpush3.bf16.msra.mxu1 %v1361_v40 }
 0x103   :  { %1167 = vmatprep.subr.bf16.mxu1 %v1363_v42 }
 0x104   :  { %v430_v21 = vadd.f32 %v429_v19, %v428_v18 }
 0x106   :  { %v432_v22 = vsel %vm431_vm12, %v417_v20, %v430_v21  ;;  %1168 = vmatpush3.bf16.msra.mxu1 %v1364_v43  ;;  %v1783_v20 = vsub.s32 0, %v1448_v13 }
 0x107   :  { %1267 = vmatmul.mubr.f32.vlgmr.msra.gmra.mxu0 %v432_v22  ;;  %1169 = vmatprep.subr.bf16.mxu1 %v1366_v45  ;;  %v1789_v22 = vld [vmem:[%s1887_s3] sm:$0xf] }
 0x108   :  { %1270 = vmatpush3.bf16.msra.mxu0 %v1353_v25  ;;  %v546_v26 = vrot.slane %v1789_v22, %v1783_v20 }
 0x109   :  { %1271 = vmatprep.subr.bf16.mxu0 %v1356_v31 }
 0x10a   :  { %1170 = vmatpush3.bf16.msra.mxu1 %v1367_v46 }
 0x10b   :  { %1171 = vmatprep.subr.bf16.mxu1 %v1369_v50 }
 0x10c   :  { %1272 = vmatpush3.bf16.msra.mxu0 %v1356_v31 }
 0x10d   :  { %1273 = vmatprep.subr.bf16.mxu0 %v1359_v36 }
 0x10e   :  { %1172 = vmatpush3.bf16.msra.mxu1 %v1370_v52 }
 0x10f   :  { %1173 = vmatprep.subr.bf16.mxu1 %v1372_v54 }
 0x110   :  { %1274 = vmatpush3.bf16.msra.mxu0 %v1359_v36  ;;  %v554_v36 = vrot.slane %v1789_v22, %v1792_v23 }
 0x111   :  { %1275 = vmatprep.subr.bf16.mxu0 %v1362_v41 }
 0x112   :  { %1174 = vmatpush3.bf16.msra.mxu1 %v1373_v55 }
 0x113   :  { %1289 = vmatprep.subr.mxu1 %v1380_v0 }
 0x114   :  { %1276 = vmatpush3.bf16.msra.mxu0 %v1362_v41 }
 0x115   :  { %1277 = vmatprep.subr.bf16.mxu0 %v1365_v44 }
 0x118   :  { %1278 = vmatpush3.bf16.msra.mxu0 %v1365_v44 }
 0x119   :  { %1279 = vmatprep.subr.bf16.mxu0 %v1368_v49 }
 0x11c   :  { %1280 = vmatpush3.bf16.msra.mxu0 %v1368_v49 }
 0x11d   :  { %1281 = vmatprep.subr.bf16.mxu0 %v1371_v51 }
 0x120   :  { %1282 = vmatpush3.bf16.msra.mxu0 %v1371_v51 }
 0x121   :  { %1283 = vmatprep.subr.bf16.mxu0 %v1374_v57 }
 0x124   :  { %1284 = vmatpush3.bf16.msra.mxu0 %v1374_v57 }
 0x1c7   :  { %v515_v58 = vpop.f32.mrf.mxu0 }
 0x1c8   :  { %v519_v59 = vmul.f32 %v515_v58, %v515_v58  ;;  %v528_v21 = vrot.slane %v515_v58, %v1783_v20 }
 0x1c9   :  { %v1268_v60 = vpop.f32.mrf.mxu0 }
 0x1ca   :  { %v521_v61 = vrot.slane %v519_v59, 7  ;;  %v529_v25 = vsub.f32 %v1690_v34, %v528_v21  ;;  %v530_v30 = vsub.f32 %v1688_v32, %v528_v21  ;;  %v531_v31 = vsub.f32 %v1694_v39, %v528_v21 }
 0x1cb   :  { %v532_v33 = vsub.f32 %v1703_v48, %v528_v21 }
 0x1cc   :  { %v523_v62 = vsub.f32 %v515_v58, %v521_v61 }
 0x1ce   :  { %v524_v18 = vmax.f32 %v523_v62, 0.0 }
 0x1d0   :  { %v533_v19 = vadd.f32 1e-05, %v524_v18 }
 0x1d2   :  { %1375 = vrsqrt.f32 %v533_v19 }
 0x1df   :  { %v1376_v24 = vpop.eup %1375 }
 0x1e0   :  { %v538_v35 = vrot.slane %v1376_v24, %v1792_v23 }
 0x1e2   :  { %v541_v38 = vmul.f32 %v538_v35, %v531_v31  ;;  %v542_v40 = vmul.f32 %v538_v35, %v532_v33  ;;  %v539_v41 = vmul.f32 %v538_v35, %v529_v25  ;;  %v540_v42 = vmul.f32 %v538_v35, %v530_v30 }
 0x1e4   :  { %v549_v43 = vmul.f32 %v546_v26, %v541_v38  ;;  %v550_v34 = vmul.f32 %v546_v26, %v542_v40  ;;  %v547_v44 = vmul.f32 %v546_v26, %v539_v41  ;;  %v548_v45 = vmul.f32 %v546_v26, %v540_v42 }
 0x1e6   :  { %v555_v46 = vadd.f32 %v554_v36, %v547_v44  ;;  %v556_v49 = vadd.f32 %v554_v36, %v548_v45  ;;  %v558_v32 = vadd.f32 %v554_v36, %v550_v34  ;;  %v557_v50 = vadd.f32 %v554_v36, %v549_v43 }
 0x1e8   :  { %v559_v39 = vmax.f32 %v555_v46, 0.0  ;;  %v560_v51 = vmax.f32 %v556_v49, 0.0  ;;  %v562_v48 = vmax.f32 %v558_v32, 0.0  ;;  %v561_v52 = vmax.f32 %v557_v50, 0.0 }
 0x1ea   :  { %v563_v54 = vrot.slane %v559_v39, 7  ;;  %v564_v55 = vrot.slane %v560_v51, 7  ;;  %v588_v57 = vpack.c.bf16 %v560_v51, %v559_v39  ;;  %v566_v58 = vrot.slane %v562_v48, 7 }
 0x1eb   :  { %v575_v59 = vrot.slane %v559_v39, 1  ;;  %v576_v60 = vrot.slane %v560_v51, 1  ;;  %v577_v61 = vrot.slane %v561_v52, 1  ;;  %v578_v19 = vrot.slane %v562_v48, 1 }
 0x1ec   :  { %817 = vmatprep.mubr.bf16.mxu1 %v588_v57  ;;  %v569_v62 = vsel %vm91_vm2, %v563_v54, %v564_v55  ;;  %v570_v18 = vsel %vm91_vm2, %v566_v58, %v563_v54  ;;  %v591_v26 = vpack.c.bf16 %v562_v48, %v561_v52  ;;  %v565_v35 = vrot.slane %v561_v52, 7 }
 0x1ed   :  { %v1093_v21 = vpack.c.bf16 %v569_v62, %v570_v18  ;;  %v580_v24 = vsel %vm104_vm0, %v576_v60, %v577_v61  ;;  %v581_v25 = vsel %vm104_vm0, %v575_v59, %v576_v60  ;;  %v579_v31 = vsel %vm104_vm0, %v577_v61, %v578_v19 }
 0x1ee   :  { %v1099_v30 = vpack.c.bf16 %v580_v24, %v581_v25  ;;  %v582_v33 = vsel %vm104_vm0, %v578_v19, %v575_v59  ;;  %v567_v38 = vsel %vm91_vm2, %v565_v35, %v566_v58  ;;  %v568_v40 = vsel %vm91_vm2, %v564_v55, %v565_v35 }
 0x1ef   :  { %1094 = vmatmul.mubr.msk.bf16.vlgmr.msra.gmra.mxu1 %vm1547_vm7, %v1093_v21  ;;  %v1102_v36 = vpack.c.bf16 %v582_v33, %v579_v31  ;;  %v1096_v47 = vpack.c.bf16 %v567_v38, %v568_v40  ;;  %v1002_v33 = vsub.s32 2, %v1448_v13 }
 0x1f0   :  { %1285 = vmatprep.mubr.msk.bf16.mxu0 %vm1533_vm4, %v1099_v30  ;;  %825 = vmatprep.mubr.bf16.mxu1 %v591_v26 }
 0x1f1   :  { %1286 = vmatmul.mubr.msk.bf16.vlgmr.msra.gmra.mxu0 %vm1552_vm8, %v1102_v36  ;;  %1290 = vmatpush3.msra.mxu1 %v1578_v1  ;;  %v1010_v36 = vsub.s32 3, %v1448_v13  ;;  %v1003_v40 = vrot.slane %v1789_v22, %v1002_v33 }
 0x1f2   :  { %1291 = vmatprep.subr.mxu1 %v1380_v0 }
 0x1f3   :  { %1292 = vmatpush3.msra.mxu1 %v1585_v2 }
 0x1f4   :  { %1293 = vmatprep.subr.mxu1 %v1380_v0 }
 0x1f5   :  { %1294 = vmatpush3.msra.mxu1 %v1592_v3 }
 0x1f6   :  { %1295 = vmatprep.subr.mxu1 %v1380_v0 }
 0x1f7   :  { %1097 = vmatmul.mubr.msk.bf16.gmra.mxu1 %vm1568_vm10, %v1096_v47 }
 0x1f8   :  { %1296 = vmatpush3.msra.mxu1 %v1599_v4  ;;  %1321 = vmatprep.mubr.msk.f32.mxu1 %vm1381_vm11, %v1380_v0 }
 0x1f9   :  { %1297 = vmatprep.subr.mxu1 %v1380_v0 }
 0x1fa   :  { %1298 = vmatpush3.msra.mxu1 %v1606_v5 }
 0x1fb   :  { %1299 = vmatprep.subr.mxu1 %v1380_v0 }
 0x1fc   :  { %1300 = vmatpush3.msra.mxu1 %v1613_v6 }
 0x1fd   :  { %1301 = vmatprep.subr.mxu1 %v1380_v0 }
 0x1fe   :  { %1302 = vmatpush3.msra.mxu1 %v1620_v7 }
 0x1ff   :  { %1303 = vmatprep.subr.mxu1 %v1380_v0 }
 0x200   :  { %1304 = vmatpush3.msra.mxu1 %v1627_v8 }
 0x201   :  { %1305 = vmatprep.subr.mxu1 %v1380_v0 }
 0x202   :  { %1306 = vmatpush3.msra.mxu1 %v1634_v9 }
 0x203   :  { %1307 = vmatprep.subr.mxu1 %v1380_v0 }
 0x204   :  { %1308 = vmatpush3.msra.mxu1 %v1641_v10 }
 0x205   :  { %1309 = vmatprep.subr.mxu1 %v1380_v0 }
 0x206   :  { %1310 = vmatpush3.msra.mxu1 %v1648_v11 }
 0x207   :  { %1311 = vmatprep.subr.mxu1 %v1380_v0 }
 0x208   :  { %1312 = vmatpush3.msra.mxu1 %v1655_v12 }
 0x209   :  { %1313 = vmatprep.subr.mxu1 %v1380_v0 }
 0x20a   :  { %1314 = vmatpush3.msra.mxu1 %v1661_v14 }
 0x20b   :  { %1315 = vmatprep.subr.mxu1 %v1380_v0 }
 0x20c   :  { %1316 = vmatpush3.msra.mxu1 %v1667_v15 }
 0x20d   :  { %1317 = vmatprep.subr.mxu1 %v1380_v0 }
 0x20e   :  { %1318 = vmatpush3.msra.mxu1 %v1676_v16 }
 0x20f   :  { %1319 = vmatprep.subr.mxu1 %v1380_v0 }
 0x210   :  { %1320 = vmatpush3.msra.mxu1 %v1683_v17 }
 0x2af   :  { %v1175_v53 = vpop.f32.mrf.mxu1 }
 0x2b1   :  { %v1287_v56 = vpop.f32.mrf.mxu0  ;;  %v1176_v63 = vpop.f32.mrf.mxu1 }
 0x2b2   :  { %v1177_v5 = vadd.f32 %v1176_v63, %v1175_v53 }
 0x2b3   :  { %v868_v1 = vpop.f32.mrf.mxu0  ;;  %v1178_v2 = vpop.f32.mrf.mxu1 }
 0x2b4   :  { %v869_v11 = vadd.f32 %v1177_v5, %v868_v1 }
 0x2b5   :  { %v1288_v3 = vpop.f32.mrf.mxu0  ;;  %v1179_v4 = vpop.f32.mrf.mxu1 }
 0x2b6   :  { %v1180_v6 = vadd.f32 %v1179_v4, %v1178_v2  ;;  %v892_v17 = vmul.f32 %v869_v11, %v869_v11  ;;  %v1011_v2 = vrot.slane %v1789_v22, %v1010_v36 }
 0x2b7   :  { %v871_v7 = vpop.f32.mrf.mxu0  ;;  %v1181_v8 = vpop.f32.mrf.mxu1 }
 0x2b8   :  { %v872_v9 = vadd.f32 %v1180_v6, %v871_v7 }
 0x2b9   :  { %v1182_v10 = vpop.f32.mrf.mxu1 }
 0x2ba   :  { %v1183_v12 = vadd.f32 %v1182_v10, %v1181_v8  ;;  %v893_v15 = vmul.f32 %v872_v9, %v872_v9  ;;  %v883_v41 = vadd.f32 %v872_v9, %v869_v11 }
 0x2bb   :  { %v1184_v14 = vpop.f32.mrf.mxu1 }
 0x2bc   :  { %v877_v0 = vadd.f32 %v1287_v56, %v1183_v12  ;;  %v896_v34 = vadd.f32 %v893_v15, %v892_v17 }
 0x2bd   :  { %v1185_v16 = vpop.f32.mrf.mxu1 }
 0x2be   :  { %v894_v42 = vmul.f32 %v877_v0, %v877_v0  ;;  %v1186_v43 = vadd.f32 %v1185_v16, %v1184_v14  ;;  %v884_v44 = vadd.f32 %v883_v41, %v877_v0 }
 0x2c0   :  { %v880_v45 = vadd.f32 %v1288_v3, %v1186_v43  ;;  %v897_v46 = vadd.f32 %v896_v34, %v894_v42 }
 0x2c2   :  { %v885_v49 = vadd.f32 %v884_v44, %v880_v45  ;;  %v895_v32 = vmul.f32 %v880_v45, %v880_v45 }
 0x2c4   :  { %v886_v50 = vrot.slane %v885_v49, 4  ;;  %v898_v39 = vadd.f32 %v897_v46, %v895_v32 }
 0x2c6   :  { %v887_v51 = vadd.f32 %v886_v50, %v885_v49  ;;  %v899_v48 = vrot.slane %v898_v39, 4 }
 0x2c8   :  { %v888_v52 = vrot.slane %v887_v51, 2  ;;  %v900_v54 = vadd.f32 %v899_v48, %v898_v39 }
 0x2ca   :  { %v889_v55 = vadd.f32 %v888_v52, %v887_v51  ;;  %v901_v57 = vrot.slane %v900_v54, 2 }
 0x2cc   :  { %v890_v58 = vrot.slane %v889_v55, 1  ;;  %v902_v59 = vadd.f32 %v901_v57, %v900_v54 }
 0x2ce   :  { %v903_v60 = vrot.slane %v902_v59, 1  ;;  %v891_v61 = vadd.f32 %v890_v58, %v889_v55 }
 0x2d0   :  { %v904_v62 = vadd.f32 %v903_v60, %v902_v59 }
 0x2d2   :  { %v905_v18 = vsel %vm431_vm12, %v891_v61, %v904_v62 }
 0x2d3   :  { %1322 = vmatmul.mubr.f32.vlgmr.msra.gmra.mxu1 %v905_v18 }
 0x393   :  { %v972_v19 = vpop.f32.mrf.mxu1 }
 0x394   :  { %v976_v21 = vmul.f32 %v972_v19, %v972_v19  ;;  %v985_v35 = vrot.slane %v972_v19, %v1783_v20 }
 0x395   :  { %v1323_v24 = vpop.f32.mrf.mxu1 }
 0x396   :  { %v978_v25 = vrot.slane %v976_v21, 7  ;;  %v986_v47 = vsub.f32 %v869_v11, %v985_v35  ;;  %v987_v53 = vsub.f32 %v872_v9, %v985_v35  ;;  %v988_v56 = vsub.f32 %v877_v0, %v985_v35 }
 0x397   :  { %v989_v63 = vsub.f32 %v880_v45, %v985_v35 }
 0x398   :  { %v980_v26 = vsub.f32 %v972_v19, %v978_v25 }
 0x39a   :  { %v981_v30 = vmax.f32 %v980_v26, 0.0 }
 0x39c   :  { %v990_v31 = vadd.f32 1e-05, %v981_v30 }
 0x39e   :  { %1377 = vrsqrt.f32 %v990_v31 }
 0x3ab   :  { %v1378_v38 = vpop.eup %1377 }
 0x3ac   :  { %v995_v1 = vrot.slane %v1378_v38, %v1792_v23 }
 0x3ae   :  { %v996_v3 = vmul.f32 %v995_v1, %v986_v47  ;;  %v997_v4 = vmul.f32 %v995_v1, %v987_v53  ;;  %v998_v5 = vmul.f32 %v995_v1, %v988_v56  ;;  %v999_v6 = vmul.f32 %v995_v1, %v989_v63 }
 0x3b0   :  { %v1004_v7 = vmul.f32 %v1003_v40, %v996_v3  ;;  %v1005_v8 = vmul.f32 %v1003_v40, %v997_v4  ;;  %v1006_v20 = vmul.f32 %v1003_v40, %v998_v5  ;;  %v1007_v10 = vmul.f32 %v1003_v40, %v999_v6 }
 0x3b2   :  { %v1012_v13 = vadd.f32 %v1011_v2, %v1004_v7  ;;  %v1013_v12 = vadd.f32 %v1011_v2, %v1005_v8  ;;  %v1014_v14 = vadd.f32 %v1011_v2, %v1006_v20  ;;  %v1015_v15 = vadd.f32 %v1011_v2, %v1007_v10 }
 0x3b4   :  { %v1016_v9 = vadd.f32 %v1012_v13, %v1484_v27  ;;  %v1017_v11 = vadd.f32 %v1013_v12, %v1489_v28  ;;  %v1018_v23 = vadd.f32 %v1014_v14, %v1514_v37  ;;  %v1019_v22 = vadd.f32 %v1015_v15, %v1494_v29 }
 0x3b6   :  { %v1020_v0 = vmax.f32 %v1016_v9, 0.0  ;;  %v1021_v16 = vmax.f32 %v1017_v11, 0.0  ;;  %v1022_v17 = vmax.f32 %v1018_v23, 0.0  ;;  %v1023_v41 = vmax.f32 %v1019_v22, 0.0 }
 0x3b8   :  { %1024 = vst [vmem:[%s1888_s5] sm:$0xff] %v1020_v0  ;;  %1025 = vst [vmem:[%s1888_s5 + $0x8] sm:$0xff] %v1021_v16 }
 0x3b9   :  { %1026 = vst [vmem:[%s1888_s5 + $0x10] sm:$0xff] %v1022_v17  ;;  %1027 = vst [vmem:[%s1888_s5 + $0x18] sm:$0xff] %v1023_v41 }

</bundles_post_ra>
